<compile_context>
chip_gen: v5e
topology: v5e:2x2
jax: 0.10.0
libtpu: 0.0.40
codegen_flags: <defaults>
</compile_context>

<pallas_src>
import functools

import jax
import jax.numpy as jnp
from jax.experimental import pallas as pl
from jax.experimental.pallas import tpu as pltpu


def policy_fwd_kernel(x_ref, w1_ref, b1_ref, w2_ref, b2_ref, out_ref,
                      *, action_dim, half):
    x = x_ref[...]                                   # (TB, obs_dim)
    tb, obs_dim = x.shape
    hidden = w1_ref.shape[1]

    # Shared layer: Linear(obs_dim -> hidden).
    if obs_dim <= 8 and tb < 256:
        # obs_dim is tiny (4): for small row blocks an MXU matmul wastes a full
        # push/drain round trip; use unrolled VPU broadcast-MACs instead.
        h = jnp.broadcast_to(b1_ref[...], (tb, hidden))
        for k in range(obs_dim):                     # static unroll
            h = h + x[:, k:k + 1] * w1_ref[k:k + 1, :]
    else:
        # Large blocks: the MXU has plenty of slack; free the VPU for softmax.
        h = jnp.dot(x, w1_ref[...], preferred_element_type=jnp.float32)
        h = h + b1_ref[...]

    # Dropout(0.5): identity at inference.
    h = jnp.maximum(h, 0.0)                          # relu

    # Action/value head: Linear(hidden -> 128 padded).  Real action columns
    # live at [0, action_dim) AND (duplicated) at [half, half+action_dim),
    # so the upper half of this tile is already the packed value output.
    logits = jnp.dot(h, w2_ref[...], preferred_element_type=jnp.float32)
    logits = logits + b2_ref[...]                    # (TB, 128)

    # Softmax over the real action lanes only (padded/duplicate lanes masked).
    lane = jax.lax.broadcasted_iota(jnp.int32, logits.shape, 1)
    valid = lane < action_dim
    masked = jnp.where(valid, logits, jnp.float32(-1e30))
    m = jnp.max(masked, axis=-1, keepdims=True)
    e = jnp.where(valid, jnp.exp(masked - m), 0.0)
    denom = jnp.sum(e, axis=-1, keepdims=True)
    probs = e / denom                                # exact: probs sum to 1

    # Single lane-dense 128-wide store: lanes [0,64) = probs, [64,128) = logits.
    out_ref[...] = jnp.where(lane < half, probs, logits)


def _round_up(x, m):
    return ((x + m - 1) // m) * m


def policy_forward(states, w1, b1, w2, b2, *, block_rows=None):
    """states: (N, obs_dim) stack of rollout states processed in one pallas_call.

    Returns (action_prob, state_value), each (N, action_dim).
    """
    n, obs_dim = states.shape
    hidden = w1.shape[1]
    action_dim = w2.shape[1]
    pad = 128                 # lane-dense output / head width
    half = pad // 2           # probs in lanes [0,64), logits in [64,128)
    assert action_dim <= half, "packed output layout assumes action_dim <= 64"

    # Pad the action head to 128 output columns; duplicate the real columns
    # into the upper half so the packed output needs no in-kernel shuffle.
    w2p = jnp.zeros((hidden, pad), jnp.float32)
    w2p = w2p.at[:, :action_dim].set(w2).at[:, half:half + action_dim].set(w2)
    b2p = jnp.zeros((1, pad), jnp.float32)
    b2p = b2p.at[:, :action_dim].set(b2).at[:, half:half + action_dim].set(b2)

    # Block-size selection: >=2 grid steps (both v7x TensorCores), multiple of
    # 8 rows, capped at 512 rows/block (VMEM/step ~ 512*(16 B in + 512 B out +
    # 512 B h) + 66 KiB weights << scoped VMEM on any generation).
    if block_rows is None:
        block_rows = min(512, max(8, _round_up(pl.cdiv(n, 2), 8)))
    block_rows = _round_up(block_rows, 8)

    grid_n = pl.cdiv(n, block_rows)
    n_pad = grid_n * block_rows
    if n_pad != n:
        states = jnp.pad(states, ((0, n_pad - n), (0, 0)))

    kernel = functools.partial(policy_fwd_kernel, action_dim=action_dim, half=half)

    out = pl.pallas_call(
        kernel,
        out_shape=jax.ShapeDtypeStruct((n_pad, pad), jnp.float32),
        grid=(grid_n,),
        in_specs=[
            # states: one row-block per grid step
            pl.BlockSpec((block_rows, obs_dim), lambda i: (i, 0)),
            # weights/biases: block index constant -> VMEM-resident across grid
            pl.BlockSpec((obs_dim, hidden), lambda i: (0, 0)),
            pl.BlockSpec((1, hidden), lambda i: (0, 0)),
            pl.BlockSpec((hidden, pad), lambda i: (0, 0)),
            pl.BlockSpec((1, pad), lambda i: (0, 0)),
        ],
        out_specs=pl.BlockSpec((block_rows, pad), lambda i: (i, 0)),
        compiler_params=pltpu.CompilerParams(
            dimension_semantics=("parallel",)),   # shards grid over v7x's 2 TCs
    )(states, w1, b1, w2p, b2p)

    probs = out[:n, :action_dim]
    value = out[:n, half:half + action_dim]
    return probs, value


def init_params(key, obs_dim, hidden, action_dim):
    """Deterministic init mimicking PyTorch nn.Linear defaults (uniform +/- 1/sqrt(fan_in))."""
    k1, k2, k3, k4 = jax.random.split(key, 4)
    bound1 = 1.0 / jnp.sqrt(jnp.float32(obs_dim))
    bound2 = 1.0 / jnp.sqrt(jnp.float32(hidden))
    w1 = jax.random.uniform(k1, (obs_dim, hidden), jnp.float32, -bound1, bound1)
    b1 = jax.random.uniform(k2, (1, hidden), jnp.float32, -bound1, bound1)
    w2 = jax.random.uniform(k3, (hidden, action_dim), jnp.float32, -bound2, bound2)
    b2 = jax.random.uniform(k4, (1, action_dim), jnp.float32, -bound2, bound2)
    return w1, b1, w2, b2


if __name__ == "__main__":
    # CartPole-like sizes: obs_dim=4, action_dim=2, hidden=128.
    # num_states = rollout timesteps x vectorized envs, batched into ONE call.
    obs_dim, hidden, action_dim = 4, 128, 2
    num_states = 64

    key = jax.random.PRNGKey(0)
    k_state, k_params = jax.random.split(key)
    states = jax.random.normal(k_state, (num_states, obs_dim), jnp.float32)
    w1, b1, w2, b2 = init_params(k_params, obs_dim, hidden, action_dim)

    probs, value = policy_forward(states, w1, b1, w2, b2)
    jax.block_until_ready((probs, value))

    # Sanity check against a pure-JAX reference.
    h_ref = jnp.maximum(states @ w1 + b1, 0.0)
    logits_ref = h_ref @ w2 + b2
    probs_ref = jax.nn.softmax(logits_ref, axis=1)

    assert value.shape == (num_states, action_dim)
    assert probs.shape == (num_states, action_dim)
    assert jnp.allclose(value, logits_ref, atol=1e-4, rtol=1e-4)
    assert jnp.allclose(probs, probs_ref, atol=1e-4, rtol=1e-4)
    assert jnp.allclose(jnp.sum(probs, axis=1), 1.0, atol=1e-5)

    print("KERNEL_OK")
</pallas_src>

<mosaic_0001>
module attributes {stable_mosaic.version = 11 : i64} {
  func.func @policy_fwd_kernel(%arg0: i32, %arg1: memref<32x4xf32, #tpu.memory_space<vmem>>, %arg2: memref<4x128xf32, #tpu.memory_space<vmem>>, %arg3: memref<1x128xf32, #tpu.memory_space<vmem>>, %arg4: memref<128x128xf32, #tpu.memory_space<vmem>>, %arg5: memref<1x128xf32, #tpu.memory_space<vmem>>, %arg6: memref<32x128xf32, #tpu.memory_space<vmem>>) attributes {dimension_semantics = [#tpu.dimension_semantics<parallel>], iteration_bounds = array<i64: 2>, scalar_prefetch = 0 : i64, scratch_operands = 0 : i64, tpu.core_type = #tpu.core_type<tc>, window_params = [{transform_indices = @transform_0, window_bounds = array<i64: 32, 4>}, {pipeline_mode = #tpu.pipeline_mode<synchronous>, transform_indices = @transform_1, window_bounds = array<i64: 4, 128>}, {pipeline_mode = #tpu.pipeline_mode<synchronous>, transform_indices = @transform_2, window_bounds = array<i64: 1, 128>}, {pipeline_mode = #tpu.pipeline_mode<synchronous>, transform_indices = @transform_3, window_bounds = array<i64: 128, 128>}, {pipeline_mode = #tpu.pipeline_mode<synchronous>, transform_indices = @transform_4, window_bounds = array<i64: 1, 128>}, {transform_indices = @transform_5, window_bounds = array<i64: 32, 128>}]} {
    %c0 = arith.constant 0 : index
    %c0_0 = arith.constant 0 : index
    %0 = vector.load %arg1[%c0, %c0_0] : memref<32x4xf32, #tpu.memory_space<vmem>>, vector<32x4xf32>
    %c0_1 = arith.constant 0 : index
    %c0_2 = arith.constant 0 : index
    %1 = vector.load %arg3[%c0_1, %c0_2] : memref<1x128xf32, #tpu.memory_space<vmem>>, vector<1x128xf32>
    %2 = vector.shape_cast %1 : vector<1x128xf32> to vector<1x128xf32>
    %3 = vector.broadcast %2 : vector<1x128xf32> to vector<32x128xf32>
    %4 = vector.extract_strided_slice %0 {offsets = [0, 0], sizes = [32, 1], strides = [1, 1]} : vector<32x4xf32> to vector<32x1xf32>
    %c0_3 = arith.constant 0 : index
    %c0_4 = arith.constant 0 : index
    %5 = vector.load %arg2[%c0_3, %c0_4] : memref<4x128xf32, #tpu.memory_space<vmem>>, vector<1x128xf32>
    %6 = vector.broadcast %4 : vector<32x1xf32> to vector<32x128xf32>
    %7 = vector.broadcast %5 : vector<1x128xf32> to vector<32x128xf32>
    %8 = arith.mulf %6, %7 : vector<32x128xf32>
    %9 = arith.addf %3, %8 : vector<32x128xf32>
    %10 = vector.extract_strided_slice %0 {offsets = [0, 1], sizes = [32, 1], strides = [1, 1]} : vector<32x4xf32> to vector<32x1xf32>
    %c1 = arith.constant 1 : index
    %c0_5 = arith.constant 0 : index
    %11 = vector.load %arg2[%c1, %c0_5] : memref<4x128xf32, #tpu.memory_space<vmem>>, vector<1x128xf32>
    %12 = vector.broadcast %10 : vector<32x1xf32> to vector<32x128xf32>
    %13 = vector.broadcast %11 : vector<1x128xf32> to vector<32x128xf32>
    %14 = arith.mulf %12, %13 : vector<32x128xf32>
    %15 = arith.addf %9, %14 : vector<32x128xf32>
    %16 = vector.extract_strided_slice %0 {offsets = [0, 2], sizes = [32, 1], strides = [1, 1]} : vector<32x4xf32> to vector<32x1xf32>
    %c2 = arith.constant 2 : index
    %c0_6 = arith.constant 0 : index
    %17 = vector.load %arg2[%c2, %c0_6] : memref<4x128xf32, #tpu.memory_space<vmem>>, vector<1x128xf32>
    %18 = vector.broadcast %16 : vector<32x1xf32> to vector<32x128xf32>
    %19 = vector.broadcast %17 : vector<1x128xf32> to vector<32x128xf32>
    %20 = arith.mulf %18, %19 : vector<32x128xf32>
    %21 = arith.addf %15, %20 : vector<32x128xf32>
    %22 = vector.extract_strided_slice %0 {offsets = [0, 3], sizes = [32, 1], strides = [1, 1]} : vector<32x4xf32> to vector<32x1xf32>
    %c3 = arith.constant 3 : index
    %c0_7 = arith.constant 0 : index
    %23 = vector.load %arg2[%c3, %c0_7] : memref<4x128xf32, #tpu.memory_space<vmem>>, vector<1x128xf32>
    %24 = vector.broadcast %22 : vector<32x1xf32> to vector<32x128xf32>
    %25 = vector.broadcast %23 : vector<1x128xf32> to vector<32x128xf32>
    %26 = arith.mulf %24, %25 : vector<32x128xf32>
    %27 = arith.addf %21, %26 : vector<32x128xf32>
    %cst = arith.constant 0.000000e+00 : f32
    %28 = vector.broadcast %cst : f32 to vector<32x128xf32>
    %29 = arith.maximumf %27, %28 : vector<32x128xf32>
    %c0_8 = arith.constant 0 : index
    %c0_9 = arith.constant 0 : index
    %30 = vector.load %arg4[%c0_8, %c0_9] : memref<128x128xf32, #tpu.memory_space<vmem>>, vector<128x128xf32>
    %cst_10 = arith.constant dense<0.000000e+00> : vector<32x128xf32>
    %31 = tpu.matmul %29, %30, %cst_10 {dimension_numbers = #tpu.dot_dimension_numbers<[1], [0], [0], [1], [0, 0, 1, 1], [], []>} : vector<32x128xf32>, vector<128x128xf32>, vector<32x128xf32> -> vector<32x128xf32>
    %c0_11 = arith.constant 0 : index
    %c0_12 = arith.constant 0 : index
    %32 = vector.load %arg5[%c0_11, %c0_12] : memref<1x128xf32, #tpu.memory_space<vmem>>, vector<1x128xf32>
    %33 = vector.broadcast %32 : vector<1x128xf32> to vector<32x128xf32>
    %34 = arith.addf %31, %33 : vector<32x128xf32>
    %35 = tpu.iota {dimensions = array<i32: 1>} : vector<32x128xi32>
    %c2_i32 = arith.constant 2 : i32
    %36 = vector.broadcast %c2_i32 : i32 to vector<32x128xi32>
    %37 = arith.cmpi slt, %35, %36 : vector<32x128xi32>
    %cst_13 = arith.constant -1.000000e+30 : f32
    %38 = vector.broadcast %cst_13 : f32 to vector<32x128xf32>
    %39 = arith.select %37, %34, %38 : vector<32x128xi1>, vector<32x128xf32>
    %cst_14 = arith.constant dense<0xFF800000> : vector<32xf32>
    %40 = vector.multi_reduction <maximumf>, %39, %cst_14 [1] : vector<32x128xf32> to vector<32xf32>
    %41 = vector.shape_cast %40 : vector<32xf32> to vector<32x1xf32>
    %42 = vector.broadcast %41 : vector<32x1xf32> to vector<32x128xf32>
    %43 = arith.subf %39, %42 : vector<32x128xf32>
    %44 = math.exp %43 : vector<32x128xf32>
    %cst_15 = arith.constant 0.000000e+00 : f32
    %45 = vector.broadcast %cst_15 : f32 to vector<32x128xf32>
    %46 = arith.select %37, %44, %45 : vector<32x128xi1>, vector<32x128xf32>
    %cst_16 = arith.constant dense<0.000000e+00> : vector<32xf32>
    %47 = vector.multi_reduction <add>, %46, %cst_16 [1] : vector<32x128xf32> to vector<32xf32>
    %48 = vector.shape_cast %47 : vector<32xf32> to vector<32x1xf32>
    %49 = vector.broadcast %48 : vector<32x1xf32> to vector<32x128xf32>
    %50 = arith.divf %46, %49 : vector<32x128xf32>
    %c64_i32 = arith.constant 64 : i32
    %51 = vector.broadcast %c64_i32 : i32 to vector<32x128xi32>
    %52 = arith.cmpi slt, %35, %51 : vector<32x128xi32>
    %53 = arith.select %52, %50, %34 : vector<32x128xi1>, vector<32x128xf32>
    %c0_17 = arith.constant 0 : index
    %c0_18 = arith.constant 0 : index
    %54 = vector.load %arg6[%c0_17, %c0_18] : memref<32x128xf32, #tpu.memory_space<vmem>>, vector<32x128xf32>
    tpu.vector_store %arg6[%c0_17, %c0_18], %53 {strides = array<i32>} : memref<32x128xf32, #tpu.memory_space<vmem>>, vector<32x128xf32>,
    return
  }
  func.func @transform_0(%arg0: i32) -> (i32, i32) {
    %c0_i32 = arith.constant 0 : i32
    %c0_i32_0 = arith.constant 0 : i32
    return %arg0, %c0_i32 : i32, i32
  }
  func.func @transform_1(%arg0: i32) -> (i32, i32) {
    %c0_i32 = arith.constant 0 : i32
    %c0_i32_0 = arith.constant 0 : i32
    %c0_i32_1 = arith.constant 0 : i32
    return %c0_i32, %c0_i32_0 : i32, i32
  }
  func.func @transform_2(%arg0: i32) -> (i32, i32) {
    %c0_i32 = arith.constant 0 : i32
    %c0_i32_0 = arith.constant 0 : i32
    %c0_i32_1 = arith.constant 0 : i32
    return %c0_i32, %c0_i32_0 : i32, i32
  }
  func.func @transform_3(%arg0: i32) -> (i32, i32) {
    %c0_i32 = arith.constant 0 : i32
    %c0_i32_0 = arith.constant 0 : i32
    %c0_i32_1 = arith.constant 0 : i32
    return %c0_i32, %c0_i32_0 : i32, i32
  }
  func.func @transform_4(%arg0: i32) -> (i32, i32) {
    %c0_i32 = arith.constant 0 : i32
    %c0_i32_0 = arith.constant 0 : i32
    %c0_i32_1 = arith.constant 0 : i32
    return %c0_i32, %c0_i32_0 : i32, i32
  }
  func.func @transform_5(%arg0: i32) -> (i32, i32) {
    %c0_i32 = arith.constant 0 : i32
    %c0_i32_0 = arith.constant 0 : i32
    return %arg0, %c0_i32 : i32, i32
  }
}

</mosaic_0001>

<bundles_post_ra>
// kernel: tpu_custom_call.1
= control target key start
LH: loop header
LB: loop body
LE: loop exit
PB: predicated region body
PF: predicated region fallthrough
CT: control target
= control target key end

     0   :  { %10 = vsyncpa [#allocation3], 0  ;;  %s1076_s0 = inlined_call_operand.vmem [shape: f32[64,4], index: 0, kind: input, shape index: {}]   ;;  %s1077_s1 = inlined_call_operand.vmem [shape: f32[4,128], index: 1, kind: input, shape index: {}]   ;;  %s1078_s2 = inlined_call_operand.vmem [shape: f32[1,128], index: 2, kind: input, shape index: {}]   ;;  %s1079_s3 = inlined_call_operand.hbm [shape: f32[128,128], index: 3, kind: input, shape index: {}]   ;;  %s1080_s4 = inlined_call_operand.vmem [shape: f32[1,128], index: 4, kind: input, shape index: {}]   ;;  %s1081_s5 = inlined_call_operand.hbm [shape: f32[64,128], index: 5, kind: output, shape index: {}]  }
   0x1   :  { %11 = vsyncpa [#allocation4], 0 }
   0x2   :  { %13 = vsyncpa [#allocation4 + $0x1], 0  ;;  %s901_s18 = smov 0   ;;  %s903_s19 = smov 0  }
   0x3   :  { %s905_s20 = smov 0   ;;  %s907_s21 = smov 0  }
   0x4 LB: > { %s922_s22 = sadd.s32 4294967295, %s860_s21   ;;  %s610_s23 = sadd.s32 4294967294, %s860_s21   ;;  %s860_s21 = sphi %s907_s21, %s1087_s21   ;;  %s856_s20 = sphi %s905_s20, %s1086_s20   ;;  %s852_s19 = sphi %s903_s19, %s1085_s19   ;;  %s848_s18 = sphi %s901_s18, %s1084_s18  }
   0x5   : > { %s926_s24 = sadd.s32 1, %s860_s21   ;;  %s136_s25 = sadd.s32 1, %s856_s20 }
   0x6   : > { %s133_s26 = ssub.s32 %s860_s21, %s926_s24  ;;  %p146_p0 = scmp.ne.s32.totalorder %s856_s20, %s852_s19 }
   0x7   : > { %p134_p1 = scmp.eq.s32.totalorder %s133_s26, 0  ;;  %p147_p2 = scmp.eq.s32.totalorder %s922_s22, 1 }
   0x8   : > { %p152_p3 = scmp.ne.s32.totalorder %s852_s19, %s848_s18  ;;  %p153_p4 = scmp.eq.s32.totalorder %s610_s23, 1 }
   0x9   : > { %s937_s27 = scalar_select %p134_p1, %s856_s20, %s136_s25  }
   0xa   : > { %p939_p5 = por %p147_p2, %p146_p0  ;;  %p943_p6 = por %p153_p4, %p152_p3 }
   0xb   : > { %p611_p7 = scmp.ge.s32.totalorder %s860_s21, 1  ;;  %p160_p8 = scmp.lt.s32.totalorder %s860_s21, 3 }
   0xc   : > { %p687_p9 = scmp.eq.s32.totalorder %s922_s22, 0  ;;  %s177_s7 = sshll.u32 %s1079_s3, 4  ;;  %s178_s7 = int_to_ptr.hbm [resolvable:$true] %s177_s7 }
   0xd   : > { %p161_p10 = pnand %p611_p7, %p160_p8  ;;  %s862_s8 = smov [#allocation2]  }
   0xe   : > { %s179_s9 = sshll.u32 %s862_s8, 4  ;;  %s863_s10 = smov 128   ;;  %s180_s9 = int_to_ptr.vmem [resolvable:$true] %s179_s9 }
   0xf   : > { %p679_p11 = pneg %p161_p10  ;;  %s864_s11 = smov 8  }
  0x10   : > { %207 = sbr.rel (%p161_p10) target bundleno = 592 (0x250), region = 40 }
  0x11   : > { %p680_p12 = pnand %p687_p9, %p679_p11 }
  0x13   : > { %682 = dma.hbm_to_vmem [thread:$0]  (!%p680_p12), %s178_s7, 2048, %s180_s9, [#allocation3], %s863_s10, %s863_s10, %s864_s11  }
  0x15   : > { %839 = dma.done.wait (%p687_p9), [#allocation3], 2048  }
  0x16   : > { %841 = vsyncadd (%p687_p9), [#allocation3], 4294965248  ;;  %s617_s12 = sshll.u32 %s922_s22, 2  ;;  %v865_v0 = vmov 1   ;;  %v866_v1 = vmov 0   ;;  %v867_v2 = vmov 2  }
  0x17   : > { %732 = vset.pattern.permute.xlu1 %v865_v0  ;;  %731 = vset.pattern.permute.xlu0 %v866_v1  ;;  %p237_p13 = scmp.lt.s32.totalorder %s617_s12, 7  ;;  %v378_v5 = vld [vmem:[#allocation2 + $0x78] sm:$0xff]  ;;  %v377_v6 = vld [vmem:[#allocation2 + $0x70] sm:$0xff]  ;;  %v376_v9 = vld [vmem:[#allocation2 + $0x68] sm:$0xff]  ;;  %v868_v10 = vmov 3   ;;  %s814_s10 = scalar_lea.hbm %s1081_s5, 64 }
  0x18   : > { %733 = vset.pattern.permute.xlu2 %v867_v2  ;;  %626 = vmatpush.msra.mxu2 %v378_v5  ;;  %v375_v11 = vld [vmem:[#allocation2 + $0x60] sm:$0xff]  ;;  %v374_v12 = vld [vmem:[#allocation2 + $0x58] sm:$0xff]  ;;  %v373_v13 = vld [vmem:[#allocation2 + $0x50] sm:$0xff] }
  0x19   : > { %s1089_s12 = smov (!%p237_p13, %s617_s12), 7  ;;  %627 = vmatpush.msra.mxu3 %v378_v5  ;;  %383 = vmatpush.msra.mxu0 %v378_v5  ;;  %v372_v14 = vld [vmem:[#allocation2 + $0x48] sm:$0xff]  ;;  %v371_v15 = vld [vmem:[#allocation2 + $0x40] sm:$0xff]  ;;  %v370_v16 = vld [vmem:[#allocation2 + $0x38] sm:$0xff] }
  0x1a   : > { %s618_s13 = sshll.u32 %s1089_s12, 3  ;;  %625 = vmatpush.msra.mxu1 %v378_v5  ;;  %629 = vmatpush.msra.mxu2 %v377_v6  ;;  %v369_v17 = vld [vmem:[#allocation2 + $0x30] sm:$0xff]  ;;  %v368_v18 = vld [vmem:[#allocation2 + $0x28] sm:$0xff]  ;;  %v367_v19 = vld [vmem:[#allocation2 + $0x20] sm:$0xff] }
  0x1b   : > { %s240_s16 = scalar_lea.vmem %s1076_s0, %s618_s13  ;;  %630 = vmatpush.msra.mxu3 %v377_v6  ;;  %384 = vmatpush.msra.mxu0 %v377_v6  ;;  %v366_v20 = vld [vmem:[#allocation2 + $0x18] sm:$0xff]  ;;  %v365_v21 = vld [vmem:[#allocation2 + $0x10] sm:$0xff]  ;;  %v364_v22 = vld [vmem:[#allocation2 + $0x8] sm:$0xff]  ;;  %s233_s13 = sand.u32 1, %s852_s19  }
  0x1c   : > { %v245_v3 = vld [vmem:[%s240_s16 + $0x10] sm:$0xff]  ;;  %v246_v4 = vld [vmem:[%s240_s16 + $0x18] sm:$0xff]  ;;  %v243_v7 = vld [vmem:[%s240_s16] sm:$0xff]  ;;  %632 = vmatpush.msra.mxu2 %v376_v9  ;;  %628 = vmatpush.msra.mxu1 %v377_v6  ;;  %s616_s14 = sshll.u32 %s233_s13, 5  ;;  %s521_s30 = scalar_lea.sflag [#allocation4], %s233_s13 }
  0x1d   : > { %291 = vperm.xlu1 %732, %v245_v3   ;;  %264 = vperm.xlu0 %731, %v245_v3   ;;  %v244_v8 = vld [vmem:[%s240_s16 + $0x8] sm:$0xff]  ;;  %v363_v23 = vld [vmem:[#allocation2] sm:$0xff]  ;;  %s1025_s15 = scalar_lea.vmem [#allocation5], %s616_s14  ;;  %s624_s16 = sshll.u32 %s922_s22, 5 }
  0x1e   : > { %317 = vperm.xlu2 %733, %v245_v3   ;;  %633 = vmatpush.msra.mxu3 %v376_v9  ;;  %v745_v26 = vld [vmem:[%s1077_s1] ss:$0 sm:$0xff]  ;;  %v742_v27 = vld [vmem:[%s1077_s1 + $0x2] ss:$0 sm:$0xff]  ;;  %v743_v28 = vld [vmem:[%s1077_s1 + $0x1] ss:$0 sm:$0xff]  ;;  %s532_s25 = scalar_lea.hbm %s1081_s5, %s624_s16 }
  0x1f   : > { %635 = vmatpush.msra.mxu2 %v375_v11  ;;  %385 = vmatpush.msra.mxu0 %v376_v9  ;;  %v744_v29 = vld [vmem:[%s1078_s2] ss:$0 sm:$0xff]  ;;  %v746_v33 = vld [vmem:[%s1077_s1 + $0x3] ss:$0 sm:$0xff]  ;;  %s533_s22 = sshll.u32 %s1025_s15, 4  ;;  %s535_s26 = sshll.u32 %s532_s25, 4  ;;  %s534_s22 = int_to_ptr.vmem [resolvable:$true] %s533_s22  ;;  %s536_s26 = int_to_ptr.hbm [resolvable:$true] %s535_s26 }
  0x20   : > { %636 = vmatpush.msra.mxu3 %v375_v11  ;;  %631 = vmatpush.msra.mxu1 %v376_v9  ;;  %s808_s6 = sshra.s32 %s536_s26, 4  ;;  %s809_s6 = int_to_ptr.hbm [resolvable:$true] %s808_s6 }
  0x21   : > { %386 = vmatpush.msra.mxu0 %v375_v11  ;;  %638 = vmatpush.msra.mxu2 %v374_v12  ;;  %s810_s7 = scalar_lea.hbm %s809_s6, 32  ;;  %p815_p3 = scmp.lt.s32.totalorder %s809_s6, %s1081_s5 }
  0x22   : > { %634 = vmatpush.msra.mxu1 %v375_v11  ;;  %639 = vmatpush.msra.mxu3 %v374_v12  ;;  %p811_p0 = scmp.ne.s32.totalorder %s809_s6, %s810_s7  ;;  %p816_p4 = scmp.lt.s32.totalorder %s814_s10, %s810_s7 }
  0x23   : > { %387 = vmatpush.msra.mxu0 %v374_v12  ;;  %641 = vmatpush.msra.mxu2 %v373_v13 }
  0x24   : > { %637 = vmatpush.msra.mxu1 %v374_v12  ;;  %642 = vmatpush.msra.mxu3 %v373_v13  ;;  %p812_p1 = pnand %p811_p0, %p939_p5  ;;  %p817_p7 = por %p816_p4, %p815_p3 }
  0x25   : > { %295 = vperm.xlu1 %732, %v246_v4   ;;  %269 = vperm.xlu0 %731, %v246_v4  }
  0x26   : > { %321 = vperm.xlu2 %733, %v246_v4   ;;  %388 = vmatpush.msra.mxu0 %v373_v13  ;;  %p813_p2 = pneg %p812_p1 }
  0x27   : > { %640 = vmatpush.msra.mxu1 %v373_v13  ;;  %644 = vmatpush.msra.mxu2 %v372_v14 }
  0x28   : > { %645 = vmatpush.msra.mxu3 %v372_v14  ;;  %389 = vmatpush.msra.mxu0 %v372_v14  ;;  %p818_p8 = pnand %p817_p7, %p813_p2 }
  0x29   : > { %643 = vmatpush.msra.mxu1 %v372_v14  ;;  %647 = vmatpush.msra.mxu2 %v371_v15 }
  0x2a   : > { %648 = vmatpush.msra.mxu3 %v371_v15  ;;  %390 = vmatpush.msra.mxu0 %v371_v15 }
  0x2b   : > { %646 = vmatpush.msra.mxu1 %v371_v15  ;;  %650 = vmatpush.msra.mxu2 %v370_v16 }
  0x2c   : > { %651 = vmatpush.msra.mxu3 %v370_v16  ;;  %391 = vmatpush.msra.mxu0 %v370_v16 }
  0x2d   : > { %734 = vset.pattern.permute.xlu1 %v866_v1  ;;  %254 = vperm.xlu0 %731, %v243_v7  }
  0x2e   : > { %259 = vperm.xlu1 %734, %v244_v8   ;;  %735 = vset.pattern.permute.xlu2 %v868_v10 }
  0x2f   : > { %343 = vperm.xlu2 %735, %v245_v3   ;;  %649 = vmatpush.msra.mxu1 %v370_v16 }
  0x30   : > { %653 = vmatpush.msra.mxu2 %v369_v17  ;;  %654 = vmatpush.msra.mxu3 %v369_v17 }
  0x31   : > { %392 = vmatpush.msra.mxu0 %v369_v17  ;;  %652 = vmatpush.msra.mxu1 %v369_v17  ;;  %v412_v17 = vlaneseq }
  0x32   : > { %656 = vmatpush.msra.mxu2 %v368_v18  ;;  %657 = vmatpush.msra.mxu3 %v368_v18 }
  0x33   : > { %393 = vmatpush.msra.mxu0 %v368_v18  ;;  %655 = vmatpush.msra.mxu1 %v368_v18  ;;  %v978_v18 = vand.u32 127, %v412_v17 }
  0x34   : > { %659 = vmatpush.msra.mxu2 %v367_v19  ;;  %660 = vmatpush.msra.mxu3 %v367_v19 }
  0x35   : > { %736 = vset.pattern.permute.xlu0 %v868_v10  ;;  %394 = vmatpush.msra.mxu0 %v367_v19  ;;  %vm414_vm0 = vcmp.lt.s32.totalorder %v978_v18, 2  ;;  %vm511_vm5 = vcmp.lt.s32.totalorder %v978_v18, 64 }
  0x36   : > { %737 = vset.pattern.permute.xlu1 %v865_v0  ;;  %347 = vperm.xlu0 %736, %v246_v4  }
  0x37   : > { %283 = vperm.xlu1 %737, %v243_v7   ;;  %738 = vset.pattern.permute.xlu2 %v865_v0 }
  0x38   : > { %287 = vperm.xlu2 %738, %v244_v8   ;;  %658 = vmatpush.msra.mxu1 %v367_v19  ;;  %v747_v19 = vld [vmem:[%s1080_s4] ss:$0 sm:$0xff] }
  0x39   : > { %662 = vmatpush.msra.mxu2 %v366_v20  ;;  %663 = vmatpush.msra.mxu3 %v366_v20 }
  0x3a   : > { %395 = vmatpush.msra.mxu0 %v366_v20  ;;  %661 = vmatpush.msra.mxu1 %v366_v20 }
  0x3b   : > { %665 = vmatpush.msra.mxu2 %v365_v21  ;;  %666 = vmatpush.msra.mxu3 %v365_v21 }
  0x3c   : > { %396 = vmatpush.msra.mxu0 %v365_v21  ;;  %664 = vmatpush.msra.mxu1 %v365_v21 }
  0x3d   : > { %668 = vmatpush.msra.mxu2 %v364_v22  ;;  %669 = vmatpush.msra.mxu3 %v364_v22 }
  0x3e   : > { %335 = vperm.xlu0 %736, %v243_v7   ;;  %397 = vmatpush.msra.mxu0 %v364_v22 }
  0x3f   : > { %739 = vset.pattern.permute.xlu1 %v867_v2  ;;  %667 = vmatpush.msra.mxu1 %v364_v22 }
  0x40   : > { %309 = vperm.xlu1 %739, %v243_v7   ;;  %740 = vset.pattern.permute.xlu2 %v867_v2 }
  0x41   : > { %313 = vperm.xlu2 %740, %v244_v8   ;;  %671 = vmatpush.msra.mxu2 %v363_v23 }
  0x42   : > { %672 = vmatpush.msra.mxu3 %v363_v23  ;;  %398 = vmatpush.msra.mxu0 %v363_v23 }
  0x43   : > { %670 = vmatpush.msra.mxu1 %v363_v23 }
  0x48   : > { %741 = vset.pattern.permute.xlu1 %v868_v10 }
  0x49   : > { %339 = vperm.xlu1 %741, %v244_v8  }
  0x78   : > { %v318_v24 = vpop.permute.xlu2 %317 }
  0x79   : > { %v327_v35 = vmul.f32 %v742_v27, %v318_v24 }
  0x80   : > { %v322_v25 = vpop.permute.xlu2 %321 }
  0x81   : > { %v328_v51 = vmul.f32 %v742_v27, %v322_v25 }
  0x89   : > { %v344_v34 = vpop.permute.xlu2 %343 }
  0x8a   : > { %v353_v39 = vmul.f32 %v746_v33, %v344_v34 }
  0x8f   : > { %v292_v30 = vpop.permute.xlu1 %291  ;;  %v265_v31 = vpop.permute.xlu0 %264 }
  0x90   : > { %v275_v32 = vmul.f32 %v745_v26, %v265_v31  ;;  %v301_v36 = vmul.f32 %v743_v28, %v292_v30 }
  0x92   : > { %v279_v37 = vadd.f32 %v744_v29, %v275_v32  ;;  %v288_v56 = vpop.permute.xlu2 %287 }
  0x93   : > { %v300_v3 = vmul.f32 %v743_v28, %v288_v56 }
  0x94   : > { %v305_v38 = vadd.f32 %v301_v36, %v279_v37 }
  0x96   : > { %v331_v40 = vadd.f32 %v327_v35, %v305_v38 }
  0x97   : > { %v296_v41 = vpop.permute.xlu1 %295  ;;  %v270_v42 = vpop.permute.xlu0 %269 }
  0x98   : > { %v357_v43 = vadd.f32 %v353_v39, %v331_v40  ;;  %v276_v45 = vmul.f32 %v745_v26, %v270_v42  ;;  %v302_v49 = vmul.f32 %v743_v28, %v296_v41 }
  0x9a   : > { %v361_v44 = vmax.f32 %v357_v43, 0.0  ;;  %v280_v48 = vadd.f32 %v744_v29, %v276_v45 }
  0x9b   : > { %v314_v5 = vpop.permute.xlu2 %313 }
  0x9c   : > { %405 = vmatmul.f32.vlgmr.msra.gmra.mxu2 %v361_v44  ;;  %v306_v50 = vadd.f32 %v302_v49, %v280_v48  ;;  %v326_v10 = vmul.f32 %v742_v27, %v314_v5 }
  0x9e   : > { %v332_v55 = vadd.f32 %v328_v51, %v306_v50 }
  0x9f   : > { %v255_v46 = vpop.permute.xlu0 %254 }
  0xa0   : > { %v260_v47 = vpop.permute.xlu1 %259  ;;  %v273_v58 = vmul.f32 %v745_v26, %v255_v46 }
  0xa1   : > { %v274_v61 = vmul.f32 %v745_v26, %v260_v47 }
  0xa2   : > { %v277_v62 = vadd.f32 %v744_v29, %v273_v58 }
  0xa3   : > { %v278_v4 = vadd.f32 %v744_v29, %v274_v61 }
  0xa5   : > { %v304_v9 = vadd.f32 %v300_v3, %v278_v4 }
  0xa7   : > { %v330_v13 = vadd.f32 %v326_v10, %v304_v9 }
  0xa8   : > { %v348_v52 = vpop.permute.xlu0 %347 }
  0xa9   : > { %v354_v53 = vmul.f32 %v746_v33, %v348_v52  ;;  %v284_v54 = vpop.permute.xlu1 %283 }
  0xaa   : > { %v299_v60 = vmul.f32 %v743_v28, %v284_v54 }
  0xab   : > { %v358_v57 = vadd.f32 %v354_v53, %v332_v55 }
  0xac   : > { %v303_v1 = vadd.f32 %v299_v60, %v277_v62 }
  0xad   : > { %v362_v59 = vmax.f32 %v358_v57, 0.0 }
  0xaf   : > { %408 = vmatmul.f32.vlgmr.msra.gmra.mxu3 %v362_v59 }
  0xb0   : > { %v336_v63 = vpop.permute.xlu0 %335 }
  0xb1   : > { %v351_v6 = vmul.f32 %v746_v33, %v336_v63 }
  0xb2   : > { %v310_v0 = vpop.permute.xlu1 %309 }
  0xb3   : > { %v325_v2 = vmul.f32 %v742_v27, %v310_v0 }
  0xb5   : > { %v329_v7 = vadd.f32 %v325_v2, %v303_v1 }
  0xb7   : > { %v355_v8 = vadd.f32 %v351_v6, %v329_v7 }
  0xb9   : > { %v359_v11 = vmax.f32 %v355_v8, 0.0 }
  0xbb   : > { %v340_v12 = vpop.permute.xlu1 %339  ;;  %399 = vmatmul.f32.vlgmr.msra.gmra.mxu0 %v359_v11 }
  0xbc   : > { %v352_v14 = vmul.f32 %v746_v33, %v340_v12 }
  0xbe   : > { %v356_v15 = vadd.f32 %v352_v14, %v330_v13 }
  0xc0   : > { %v360_v16 = vmax.f32 %v356_v15, 0.0 }
  0xc2   : > { %402 = vmatmul.f32.vlgmr.msra.gmra.mxu1 %v360_v16 }
 0x11f   : > { %v406_v20 = vpop.f32.mrf.mxu2 }
 0x120   : > { %v984_v21 = vadd.f32 %v747_v19, %v406_v20 }
 0x122   : > { %v417_v22 = vsel %vm414_vm0, %v984_v21, -1e+30 }
 0x123   : > { %423 = vmax.xlane.f32.xlu1 %v417_v22 }
 0x132   : > { %v409_v26 = vpop.f32.mrf.mxu3 }
 0x133   : > { %v994_v27 = vadd.f32 %v747_v19, %v409_v26 }
 0x135   : > { %v418_v31 = vsel %vm414_vm0, %v994_v27, -1e+30 }
 0x138   : > { %v400_v23 = vpop.f32.mrf.mxu0 }
 0x139   : > { %v989_v24 = vadd.f32 %v747_v19, %v400_v23 }
 0x13b   : > { %v415_v25 = vsel %vm414_vm0, %v989_v24, -1e+30 }
 0x13c   : > { %419 = vmax.xlane.f32.xlu2 %v415_v25 }
 0x13f   : > { %v403_v28 = vpop.f32.mrf.mxu1 }
 0x140   : > { %v996_v29 = vadd.f32 %v747_v19, %v403_v28 }
 0x142   : > { %v416_v30 = vsel %vm414_vm0, %v996_v29, -1e+30 }
 0x143   : > { %421 = vmax.xlane.f32.xlu0 %v416_v30 }
 0x144   : > { %425 = vmax.xlane.f32.xlu2 %v418_v31 }
 0x196   : > { %v424_v32 = vpop.xlane.xlu1 %423 }
 0x197   : > { %v429_v33 = vsub.f32 %v417_v22, %v424_v32 }
 0x199   : > { %v435_v34 = vmul.f32 1.442695, %v429_v33 }
 0x19b   : > { %748 = vpow2.f32 %v435_v34 }
 0x1a1   : > { %v749_v35 = vpop.eup %748 }
 0x1a2   : > { %v441_v36 = vsel %vm414_vm0, %v749_v35, 0.0 }
 0x1a3   : > { %447 = vadd.xlane.f32.xlu1 %v441_v36 }
 0x1af   : > { %v420_v37 = vpop.xlane.xlu2 %419 }
 0x1b0   : > { %v427_v38 = vsub.f32 %v415_v25, %v420_v37 }
 0x1b2   : > { %v431_v39 = vmul.f32 1.442695, %v427_v38 }
 0x1b4   : > { %750 = vpow2.f32 %v431_v39 }
 0x1b6   : > { %v422_v40 = vpop.xlane.xlu0 %421 }
 0x1b7   : > { %v428_v41 = vsub.f32 %v416_v30, %v422_v40  ;;  %v426_v42 = vpop.xlane.xlu2 %425 }
 0x1b8   : > { %v430_v43 = vsub.f32 %v418_v31, %v426_v42 }
 0x1b9   : > { %v433_v44 = vmul.f32 1.442695, %v428_v41 }
 0x1ba   : > { %v751_v45 = vpop.eup %750  ;;  %v437_v46 = vmul.f32 1.442695, %v430_v43 }
 0x1bb   : > { %752 = vpow2.f32 %v433_v44  ;;  %v439_v47 = vsel %vm414_vm0, %v751_v45, 0.0 }
 0x1bc   : > { %754 = vpow2.f32 %v437_v46  ;;  %443 = vadd.xlane.f32.xlu2 %v439_v47 }
 0x1c1   : > { %v753_v48 = vpop.eup %752 }
 0x1c2   : > { %v755_v49 = vpop.eup %754  ;;  %v1010_v50 = vsel %vm414_vm0, %v753_v48, 0.0 }
 0x1c3   : > { %445 = vadd.xlane.f32.xlu0 %v1010_v50  ;;  %v1015_v51 = vsel %vm414_vm0, %v755_v49, 0.0 }
 0x1c4   : > { %449 = vadd.xlane.f32.xlu2 %v1015_v51 }
 0x216   : > { %v448_v52 = vpop.xlane.xlu1 %447 }
 0x217   : > { %756 = vrcp.f32 %v448_v52  ;;  %v492_v56 = vand.u32 2147483648, %v448_v52  ;;  %v490_v58 = vand.u32 2147483647, %v448_v52  ;;  %vm486_vm2 = vweird.f32 %v448_v52 }
 0x219   : > { %v493_v60 = vor.u32 1.1754944e-38, %v492_v56  ;;  %vm491_vm4 = vcmp.eq.f32.partialorder %v490_v58, 8.507059e+37 }
 0x21d   : > { %v757_v53 = vpop.eup %756 }
 0x21e   : > { %v482_v54 = vmul.f32 %v757_v53, %v448_v52  ;;  %vm487_vm1 = vweird.f32 %v757_v53 }
 0x21f   : > { %vm488_vm3 = vmor %vm486_vm2, %vm487_vm1 }
 0x220   : > { %v483_v55 = vsub.f32 1.0, %v482_v54 }
 0x222   : > { %v484_v57 = vmul.f32 %v757_v53, %v483_v55 }
 0x224   : > { %v485_v59 = vadd.f32 %v757_v53, %v484_v57 }
 0x226   : > { %v489_v61 = vsel %vm488_vm3, %v757_v53, %v485_v59 }
 0x227   : > { %v494_v62 = vsel %vm491_vm4, %v493_v60, %v489_v61 }
 0x228   : > { %v495_v63 = vmul.f32 %v494_v62, %v441_v36 }
 0x22a   : > { %v514_v0 = vsel %vm511_vm5, %v495_v63, %v984_v21 }
 0x22b   : > { %518 = vst [vmem:[%s1025_s15 + $0x10] sm:$0xff] %v514_v0 }
 0x22f   : > { %v444_v1 = vpop.xlane.xlu2 %443 }
 0x230   : > { %758 = vrcp.f32 %v444_v1  ;;  %v462_v7 = vand.u32 2147483648, %v444_v1  ;;  %v460_v9 = vand.u32 2147483647, %v444_v1  ;;  %vm456_vm7 = vweird.f32 %v444_v1 }
 0x232   : > { %v463_v13 = vor.u32 1.1754944e-38, %v462_v7  ;;  %vm461_vm9 = vcmp.eq.f32.partialorder %v460_v9, 8.507059e+37 }
 0x236   : > { %v759_v2 = vpop.eup %758  ;;  %v446_v3 = vpop.xlane.xlu0 %445 }
 0x237   : > { %v452_v4 = vmul.f32 %v759_v2, %v444_v1  ;;  %760 = vrcp.f32 %v446_v3  ;;  %v450_v5 = vpop.xlane.xlu2 %449  ;;  %vm457_vm6 = vweird.f32 %v759_v2  ;;  %v477_v21 = vand.u32 2147483648, %v446_v3 }
 0x238   : > { %762 = vrcp.f32 %v450_v5  ;;  %vm458_vm8 = vmor %vm456_vm7, %vm457_vm6  ;;  %v475_v25 = vand.u32 2147483647, %v446_v3  ;;  %v507_v26 = vand.u32 2147483648, %v450_v5  ;;  %v505_v31 = vand.u32 2147483647, %v450_v5 }
 0x239   : > { %v453_v6 = vsub.f32 1.0, %v452_v4  ;;  %vm471_vm12 = vweird.f32 %v446_v3  ;;  %v478_v33 = vor.u32 1.1754944e-38, %v477_v21  ;;  %vm501_vm14 = vweird.f32 %v450_v5 }
 0x23a   : > { %vm476_vm15 = vcmp.eq.f32.partialorder %v475_v25, 8.507059e+37  ;;  %vm506_vm1 = vcmp.eq.f32.partialorder %v505_v31, 8.507059e+37 }
 0x23b   : > { %v454_v8 = vmul.f32 %v759_v2, %v453_v6 }
 0x23d   : > { %v761_v10 = vpop.eup %760  ;;  %v455_v11 = vadd.f32 %v759_v2, %v454_v8 }
 0x23e   : > { %v763_v12 = vpop.eup %762  ;;  %v467_v14 = vmul.f32 %v761_v10, %v446_v3  ;;  %vm472_vm10 = vweird.f32 %v761_v10 }
 0x23f   : > { %v459_v15 = vsel %vm458_vm8, %v759_v2, %v455_v11  ;;  %v497_v16 = vmul.f32 %v763_v12, %v450_v5  ;;  %vm502_vm11 = vweird.f32 %v763_v12  ;;  %vm473_vm13 = vmor %vm471_vm12, %vm472_vm10 }
 0x240   : > { %v464_v17 = vsel %vm461_vm9, %v463_v13, %v459_v15  ;;  %v468_v19 = vsub.f32 1.0, %v467_v14  ;;  %vm503_vm0 = vmor %vm501_vm14, %vm502_vm11 }
 0x241   : > { %v465_v20 = vmul.f32 %v464_v17, %v439_v47  ;;  %v498_v22 = vsub.f32 1.0, %v497_v16 }
 0x242   : > { %v469_v23 = vmul.f32 %v761_v10, %v468_v19 }
 0x243   : > { %v512_v28 = vsel %vm511_vm5, %v465_v20, %v989_v24  ;;  %v499_v30 = vmul.f32 %v763_v12, %v498_v22  ;;  %v508_v24 = vor.u32 1.1754944e-38, %v507_v26 }
 0x244   : > { %516 = vst [vmem:[%s1025_s15] sm:$0xff] %v512_v28  ;;  %v470_v32 = vadd.f32 %v761_v10, %v469_v23 }
 0x245   : > { %v500_v34 = vadd.f32 %v763_v12, %v499_v30 }
 0x246   : > { %v474_v35 = vsel %vm473_vm13, %v761_v10, %v470_v32 }
 0x247   : > { %v479_v36 = vsel %vm476_vm15, %v478_v33, %v474_v35  ;;  %v504_v37 = vsel %vm503_vm0, %v763_v12, %v500_v34 }
 0x248   : > { %v480_v38 = vmul.f32 %v479_v36, %v1010_v50  ;;  %v509_v39 = vsel %vm506_vm1, %v508_v24, %v504_v37 }
 0x249   : > { %v510_v40 = vmul.f32 %v509_v39, %v1015_v51 }
 0x24a   : > { %v513_v41 = vsel %vm511_vm5, %v480_v38, %v996_v29 }
 0x24b   : > { %517 = vst [vmem:[%s1025_s15 + $0x8] sm:$0xff] %v513_v41  ;;  %v515_v42 = vsel %vm511_vm5, %v510_v40, %v994_v27 }
 0x24c   : > { %519 = vst [vmem:[%s1025_s15 + $0x18] sm:$0xff] %v515_v42 }
 0x24d   : > { %821 = shalt.err (!%p818_p8)
}
 0x24e   : > { %s869_s13 = smov 128   ;;  %s870_s14 = smov 8  }
 0x24f   : > { %677 = dma.vmem_to_hbm [thread:$0]  (%p939_p5), %s534_s22, 512, %s536_s26, %s521_s30, %s869_s13, %s869_s13, %s870_s14  }
 0x250 PF: > { %p689_p9 = scmp.ge.s32.totalorder %s860_s21, 2  ;;  %s550_s15 = sand.u32 1, %s848_s18  }
 0x251   : > { %s551_s16 = scalar_lea.sflag [#allocation4], %s550_s15 }
 0x252   : > { %p684_p10 = pnand %p689_p9, %p943_p6 }
 0x254   : > { %p685_p11 = pneg %p684_p10 }
 0x256   : > { %843 = dma.done.wait (%p685_p11), %s551_s16, 512  }
 0x257   : > { %845 = vsyncadd (%p685_p11), %s551_s16, 4294966784  ;;  %p16_p12 = scmp.ge.s32.totalorder %s926_s24, 4   ;;  %s1084_s18 = smov %s852_s19 }
 0x258   : > { %s1085_s19 = smov %s856_s20  ;;  %s1086_s20 = smov %s937_s27 }
 0x259   : > { %s1087_s21 = smov %s926_s24  ;;  %18 = sbr.rel (!%p16_p12) target bundleno = 4 (0x4), region = 80 }
 0x25e   :  { %557 = vsyncpa [#allocation3], 1 }
 0x25f   :  { %559 = vsyncpa [#allocation3 + $0x1], 1 }
 0x260   :  { %560 = vsyncpa [#allocation4], 1 }
 0x261   :  { %562 = vsyncpa [#allocation4 + $0x1], 1 }

</bundles_post_ra>
